<compile_context>
chip_gen: v7x
topology: tpu7x:2x2x1
jax: 0.10.0
libtpu: 0.0.40
codegen_flags: <defaults>
</compile_context>

<pallas_src>
import jax
import jax.numpy as jnp
import numpy as np
from jax.experimental import pallas as pl
from jax.experimental.pallas import tpu as pltpu


# ---------------------------------------------------------------------------
# Kernels
# ---------------------------------------------------------------------------
def _linear_flat_kernel(xf_ref, a_ref, b_ref, of_ref):
    """Lane-dense flat-view linear:  of = xf @ A + b_tiled.

    xf_ref : (TR, G*IN)   G batch rows packed per slab row (contiguous view of x)
    a_ref  : (G*IN, G*OUT) block-diagonal weight (G copies of W^T on the diag)
    b_ref  : (1, G*OUT)   bias tiled G times
    of_ref : (TR, G*OUT)  output slab (contiguous view of (TR*G, OUT))
    """
    acc = jnp.dot(xf_ref[...], a_ref[...],
                  preferred_element_type=jnp.float32,
                  precision=jax.lax.Precision.HIGHEST)
    of_ref[...] = (acc + b_ref[...]).astype(of_ref.dtype)


def _linear_small_kernel(x_ref, wt_ref, b_ref, o_ref):
    """Gridless whole-array path for tiny (single-step) batches.

    x_ref : (B, IN)   activations
    wt_ref: (IN, OUT) weight transposed once in the wrapper (8 floats, O(1))
    b_ref : (1, OUT)  bias
    o_ref : (B, OUT)  output
    """
    x = x_ref[...]
    wt = wt_ref[...]
    in_f = wt.shape[0]
    if in_f <= 16:
        # Tiny contraction dim: unrolled VPU broadcast multiply-add; skips the
        # MXU push/pop latency entirely.
        acc = x[:, 0:1] * wt[0:1, :]
        for k in range(1, in_f):
            acc = acc + x[:, k:k + 1] * wt[k:k + 1, :]
    else:
        acc = jnp.dot(x, wt, preferred_element_type=jnp.float32,
                      precision=jax.lax.Precision.HIGHEST)
    o_ref[...] = (acc + b_ref[...]).astype(o_ref.dtype)


# ---------------------------------------------------------------------------
# Wrapper
# ---------------------------------------------------------------------------
_FLAT_PATH_MIN_BATCH = 256   # any batch >= this goes through the lane-dense path
_MAX_TILE_ROWS = 2048        # slab rows/tile -> ~6 MiB double-buffered blocks
                             # (< v5e's 16 MiB scoped-VMEM default: no
                             #  vmem_limit_bytes override needed on any gen)


def _pick_tile_rows(m_rows):
    """Largest useful tile: >=2 balanced tiles when possible (v7x megacore),
    multiple of 8 (sublane tiling), capped by the VMEM budget above."""
    if m_rows <= 8:
        return m_rows                      # single full-extent tile
    half = -(-m_rows // 2)                 # ceil(m_rows / 2)  -> >= 2 tiles
    half = -(-half // 8) * 8               # round up to a multiple of 8
    return min(_MAX_TILE_ROWS, half)


def qnetwork_forward(x, w, b):
    """Pallas implementation of QNetwork.forward (a single nn.Linear).

    x: (batch, in_features) f32
    w: (out_features, in_features) f32   (PyTorch layout)
    b: (out_features,) f32
    returns (batch, out_features) f32
    """
    batch, in_features = x.shape
    out_features = w.shape[0]

    flat_ok = (out_features <= 128) and (128 % out_features == 0)
    if flat_ok and batch >= _FLAT_PATH_MIN_BATCH:
        # ---------------- Replay-buffer path: lane-dense flat views ----------
        group = 128 // out_features            # batch rows packed per slab row
        pad = (-batch) % group
        if pad:
            x = jnp.pad(x, ((0, pad), (0, 0)))
        padded = batch + pad
        m_rows = padded // group
        k_dim = group * in_features            # 256 for CartPole
        n_dim = group * out_features           # 128 -> unmasked lane-dense vst

        # Contiguous (copy-free) flat view of x; no wrapper transpose.
        xf = x.reshape(m_rows, k_dim)
        # Block-diagonal weight A[g*IN+k, g*OUT+o] = w[o, k]; bias tiled G times.
        a = jnp.kron(jnp.eye(group, dtype=w.dtype), w.T)
        b_tiled = jnp.tile(b, group).reshape(1, n_dim)

        tile_rows = _pick_tile_rows(m_rows)
        grid = (pl.cdiv(m_rows, tile_rows),)

        yf = pl.pallas_call(
            _linear_flat_kernel,
            out_shape=jax.ShapeDtypeStruct((m_rows, n_dim), jnp.float32),
            grid=grid,
            in_specs=[
                # Batch-row tile varies with the grid index (auto double-buffered
                # by the BlockSpec pipeline regardless of dimension_semantics).
                pl.BlockSpec((tile_rows, k_dim), lambda i: (i, 0)),
                # Weight / bias: constant block index -> stay resident in VMEM.
                pl.BlockSpec((k_dim, n_dim), lambda i: (0, 0)),
                pl.BlockSpec((1, n_dim), lambda i: (0, 0)),
            ],
            out_specs=pl.BlockSpec((tile_rows, n_dim), lambda i: (i, 0)),
            compiler_params=pltpu.CompilerParams(
                # Megacore-sharding hint only (>=2 tiles are provided so both
                # v7x TensorCores get work); ~neutral on single-TC v5e/v6e.
                dimension_semantics=("parallel",),
            ),
        )(xf, a, b_tiled)

        y = yf.reshape(padded, out_features)   # contiguous view back to (B, OUT)
        return y[:batch] if pad else y

    # ---------------- Single-step / small-batch path: gridless, VPU ----------
    wt = w.T                                   # O(IN*OUT) = 8 floats, once
    b2 = b.reshape(1, out_features)
    return pl.pallas_call(
        _linear_small_kernel,
        out_shape=jax.ShapeDtypeStruct((batch, out_features), jnp.float32),
        in_specs=[
            pl.BlockSpec(memory_space=pltpu.MemorySpace.VMEM),
            pl.BlockSpec(memory_space=pltpu.MemorySpace.VMEM),
            pl.BlockSpec(memory_space=pltpu.MemorySpace.VMEM),
        ],
        out_specs=pl.BlockSpec(memory_space=pltpu.MemorySpace.VMEM),
    )(x, wt, b2)


# ---------------------------------------------------------------------------
# Demo / self-test
# ---------------------------------------------------------------------------
if __name__ == "__main__":
    # CartPole-V1: observation dim = 4, action dim = 2.
    input_size = 4
    output_size = 2

    key = jax.random.PRNGKey(0)
    kx, kw, kb, kx2, kx3 = jax.random.split(key, 5)

    # Deterministic parameters mimicking nn.Linear's U(-1/sqrt(in), 1/sqrt(in)).
    bound = 1.0 / (input_size ** 0.5)
    w = jax.random.uniform(kw, (output_size, input_size), jnp.float32, -bound, bound)
    b = jax.random.uniform(kb, (output_size,), jnp.float32, -bound, bound)

    qnet = jax.jit(qnetwork_forward)

    def _ref(xv):
        return (np.asarray(xv, np.float64) @ np.asarray(w, np.float64).T
                + np.asarray(b, np.float64))

    # 1) Single-step inference path: gridless whole-array VPU kernel.
    x_small = jax.random.normal(kx, (8, input_size), jnp.float32)
    y_small = jax.block_until_ready(qnet(x_small, w, b))
    assert y_small.shape == (8, output_size)
    assert np.allclose(np.asarray(y_small), _ref(x_small), atol=1e-4, rtol=1e-4)

    # 2) Replay-buffer path: lane-dense flat view, 2 parallel tiles.
    x_large = jax.random.normal(kx2, (1024, input_size), jnp.float32)
    y_large = jax.block_until_ready(qnet(x_large, w, b))
    assert y_large.shape == (1024, output_size)
    assert np.allclose(np.asarray(y_large), _ref(x_large), atol=1e-4, rtol=1e-4)

    # 3) Replay-buffer path with a batch that is not a multiple of the group
    #    size (exercises the pad + clip logic).
    x_rag = jax.random.normal(kx3, (300, input_size), jnp.float32)
    y_rag = jax.block_until_ready(qnet(x_rag, w, b))
    assert y_rag.shape == (300, output_size)
    assert np.allclose(np.asarray(y_rag), _ref(x_rag), atol=1e-4, rtol=1e-4)

    print("KERNEL_OK")
</pallas_src>

<mosaic_0001>
module attributes {stable_mosaic.version = 11 : i64} {
  func.func @_linear_small_kernel(%arg0: memref<8x4xf32, #tpu.memory_space<vmem>>, %arg1: memref<4x2xf32, #tpu.memory_space<vmem>>, %arg2: memref<1x2xf32, #tpu.memory_space<vmem>>, %arg3: memref<8x2xf32, #tpu.memory_space<vmem>>) attributes {dimension_semantics = [], scalar_prefetch = 0 : i64, scratch_operands = 0 : i64, tpu.core_type = #tpu.core_type<tc>} {
    %c0 = arith.constant 0 : index
    %c0_0 = arith.constant 0 : index
    %0 = vector.load %arg0[%c0, %c0_0] : memref<8x4xf32, #tpu.memory_space<vmem>>, vector<8x4xf32>
    %c0_1 = arith.constant 0 : index
    %c0_2 = arith.constant 0 : index
    %1 = vector.load %arg1[%c0_1, %c0_2] : memref<4x2xf32, #tpu.memory_space<vmem>>, vector<4x2xf32>
    %2 = vector.extract_strided_slice %0 {offsets = [0, 0], sizes = [8, 1], strides = [1, 1]} : vector<8x4xf32> to vector<8x1xf32>
    %3 = vector.extract_strided_slice %1 {offsets = [0, 0], sizes = [1, 2], strides = [1, 1]} : vector<4x2xf32> to vector<1x2xf32>
    %4 = vector.broadcast %2 : vector<8x1xf32> to vector<8x2xf32>
    %5 = vector.broadcast %3 : vector<1x2xf32> to vector<8x2xf32>
    %6 = arith.mulf %4, %5 : vector<8x2xf32>
    %7 = vector.extract_strided_slice %0 {offsets = [0, 1], sizes = [8, 1], strides = [1, 1]} : vector<8x4xf32> to vector<8x1xf32>
    %8 = vector.extract_strided_slice %1 {offsets = [1, 0], sizes = [1, 2], strides = [1, 1]} : vector<4x2xf32> to vector<1x2xf32>
    %9 = vector.broadcast %7 : vector<8x1xf32> to vector<8x2xf32>
    %10 = vector.broadcast %8 : vector<1x2xf32> to vector<8x2xf32>
    %11 = arith.mulf %9, %10 : vector<8x2xf32>
    %12 = arith.addf %6, %11 : vector<8x2xf32>
    %13 = vector.extract_strided_slice %0 {offsets = [0, 2], sizes = [8, 1], strides = [1, 1]} : vector<8x4xf32> to vector<8x1xf32>
    %14 = vector.extract_strided_slice %1 {offsets = [2, 0], sizes = [1, 2], strides = [1, 1]} : vector<4x2xf32> to vector<1x2xf32>
    %15 = vector.broadcast %13 : vector<8x1xf32> to vector<8x2xf32>
    %16 = vector.broadcast %14 : vector<1x2xf32> to vector<8x2xf32>
    %17 = arith.mulf %15, %16 : vector<8x2xf32>
    %18 = arith.addf %12, %17 : vector<8x2xf32>
    %19 = vector.extract_strided_slice %0 {offsets = [0, 3], sizes = [8, 1], strides = [1, 1]} : vector<8x4xf32> to vector<8x1xf32>
    %20 = vector.extract_strided_slice %1 {offsets = [3, 0], sizes = [1, 2], strides = [1, 1]} : vector<4x2xf32> to vector<1x2xf32>
    %21 = vector.broadcast %19 : vector<8x1xf32> to vector<8x2xf32>
    %22 = vector.broadcast %20 : vector<1x2xf32> to vector<8x2xf32>
    %23 = arith.mulf %21, %22 : vector<8x2xf32>
    %24 = arith.addf %18, %23 : vector<8x2xf32>
    %c0_3 = arith.constant 0 : index
    %c0_4 = arith.constant 0 : index
    %25 = vector.load %arg2[%c0_3, %c0_4] : memref<1x2xf32, #tpu.memory_space<vmem>>, vector<1x2xf32>
    %26 = vector.broadcast %25 : vector<1x2xf32> to vector<8x2xf32>
    %27 = arith.addf %24, %26 : vector<8x2xf32>
    %c0_5 = arith.constant 0 : index
    %c0_6 = arith.constant 0 : index
    %28 = vector.load %arg3[%c0_5, %c0_6] : memref<8x2xf32, #tpu.memory_space<vmem>>, vector<8x2xf32>
    tpu.vector_store %arg3[%c0_5, %c0_6], %27 {strides = array<i32>} : memref<8x2xf32, #tpu.memory_space<vmem>>, vector<8x2xf32>,
    return
  }
}

</mosaic_0001>

<bundles_post_ra>
// kernel: qnetwork_forward.1
= control target key start
LH: loop header
LB: loop body
LE: loop exit
PB: predicated region body
PF: predicated region fallthrough
CT: control target
= control target key end

     0   :  { %v80_v0 = vmov 0   ;;  %v81_v2 = vmov 2   ;;  %v82_v3 = vmov 1   ;;  %v83_v4 = vmov 3   ;;  %s116_s0 = inlined_call_operand.vmem [shape: f32[8,4], index: 0, kind: input, shape index: {}]   ;;  %s117_s1 = inlined_call_operand.vmem [shape: f32[4,2], index: 1, kind: input, shape index: {}]   ;;  %s118_s2 = inlined_call_operand.vmem [shape: f32[1,2], index: 2, kind: input, shape index: {}]   ;;  %s119_s3 = inlined_call_operand.vmem [shape: f32[8,2], index: 3, kind: output, shape index: {}]  }
   0x1   :  { %75 = vset.pattern.permute.xlu0 %v80_v0  ;;  %v14_v1 = vld [vmem:[%s116_s0] sm:$0xff]  ;;  %77 = vset.pattern.permute.xlu1 %v81_v2  ;;  %v21_v5 = vlaneseq  ;;  %vm64_vm0 = vcmask 15360  }
   0x2   :  { %18 = vperm.xlu0 %75, %v14_v1   ;;  %37 = vperm.xlu1 %77, %v14_v1   ;;  %v15_v9 = vld [vmem:[%s117_s1] sm:$0xf] }
   0x3   :  { %v22_v6 = vshrl.u32 %v21_v5, 7  ;;  %v70_v26 = vld [vmem:[%s118_s2] ss:$0 sm:$0xff] }
   0x5   :  { %v23_v7 = vsub.s32 0, %v22_v6  ;;  %v32_v8 = vsub.s32 1, %v22_v6  ;;  %v42_v11 = vsub.s32 2, %v22_v6  ;;  %v52_v13 = vsub.s32 3, %v22_v6 }
   0x6   :  { %76 = vset.pattern.permute.xlu0 %v82_v3  ;;  %78 = vset.pattern.permute.xlu1 %v83_v4 }
   0x7   :  { %27 = vperm.xlu0 %76, %v14_v1   ;;  %47 = vperm.xlu1 %78, %v14_v1   ;;  %v24_v14 = vrot.slane %v15_v9, %v23_v7  ;;  %v33_v15 = vrot.slane %v15_v9, %v32_v8  ;;  %v43_v16 = vrot.slane %v15_v9, %v42_v11 }
   0x8   :  { %v53_v17 = vrot.slane %v15_v9, %v52_v13 }
   0xb   :  { %79 = vset.pattern.permute.xlu0 %v83_v4 }
  0x81   :  { %v19_v10 = vpop.permute.xlu0 %18  ;;  %v38_v12 = vpop.permute.xlu1 %37 }
  0x82   :  { %v25_v20 = vmul.f32 %v24_v14, %v19_v10  ;;  %v44_v22 = vmul.f32 %v43_v16, %v38_v12 }
  0x86   :  { %v28_v18 = vpop.permute.xlu0 %27  ;;  %v48_v19 = vpop.permute.xlu1 %47 }
  0x87   :  { %v34_v21 = vmul.f32 %v33_v15, %v28_v18  ;;  %v54_v24 = vmul.f32 %v53_v17, %v48_v19 }
  0x89   :  { %v35_v23 = vadd.f32 %v34_v21, %v25_v20 }
  0x8b   :  { %v45_v25 = vadd.f32 %v44_v22, %v35_v23 }
  0x8d   :  { %v55_v27 = vadd.f32 %v54_v24, %v45_v25 }
  0x8f   :  { %v63_v28 = vadd.f32 %v70_v26, %v55_v27 }
  0x91   :  { %65 = vst.msk [vmem:[%s119_s3] sm:$0xff] %vm64_vm0, %v63_v28 }

</bundles_post_ra>
